<compile_context>
chip_gen: v7x
topology: tpu7x:2x2x1
jax: 0.10.0
libtpu: 0.0.40
codegen_flags: <defaults>
</compile_context>

<pallas_src>
import functools

import jax
import jax.numpy as jnp
from jax.experimental import pallas as pl
from jax.experimental.pallas import tpu as pltpu

IN_F = 79        # real input features
IN_PAD = 128     # 79  -> 128 (MXU-aligned K for layer 1, padded in-kernel)
HID_PAD = 256    # 178 -> 256 (one native 256x256 MXU tile on v6e/v7x)


def mlp_kernel(x_ref, w1_ref, b1_ref, w2_ref, b2_ref, w3_ref, b3_ref,
               w4_ref, b4_ref, o_ref, xpad_ref):
    # Zero-extend the 79 input features to 128 lanes in VMEM scratch.
    # Re-zeroed every grid step (cheap) so it is correct under megacore
    # sharding of the batch axis and never carries NaN/garbage into the MXU.
    xpad_ref[...] = jnp.zeros_like(xpad_ref)
    xpad_ref[:, :IN_F] = x_ref[...].astype(jnp.bfloat16)

    # Layers 1-3: bf16 operands on the MXU, f32 accumulation; bias+ReLU on VPU.
    z = jnp.dot(xpad_ref[...], w1_ref[...], preferred_element_type=jnp.float32)
    z = jnp.maximum(z + b1_ref[...], 0.0)

    z = jnp.dot(z.astype(jnp.bfloat16), w2_ref[...],
                preferred_element_type=jnp.float32)
    z = jnp.maximum(z + b2_ref[...], 0.0)

    z = jnp.dot(z.astype(jnp.bfloat16), w3_ref[...],
                preferred_element_type=jnp.float32)
    z = jnp.maximum(z + b3_ref[...], 0.0)

    # Final 178->1 layer in f32 as multiply + lane-reduce (XLU slot is idle
    # here); produces a (tile, 1) result -> 4 B/row of output HBM traffic.
    y = jnp.sum(z * w4_ref[...], axis=-1, keepdims=True) + b4_ref[...]
    o_ref[...] = y.astype(o_ref.dtype)


def _pad_to(a, shape):
    pads = [(0, t - s) for s, t in zip(a.shape, shape)]
    return jnp.pad(a, pads)


def _round_up(x, m):
    return ((x + m - 1) // m) * m


def prepare_params(params):
    """One-time pad + cast of weights/biases into kernel-ready layout."""
    (w1, b1), (w2, b2), (w3, b3), (w4, b4) = params
    w1p = _pad_to(w1, (IN_PAD, HID_PAD)).astype(jnp.bfloat16)    # (128, 256)
    b1p = _pad_to(b1, (1, HID_PAD)).astype(jnp.float32)
    w2p = _pad_to(w2, (HID_PAD, HID_PAD)).astype(jnp.bfloat16)   # (256, 256)
    b2p = _pad_to(b2, (1, HID_PAD)).astype(jnp.float32)
    w3p = _pad_to(w3, (HID_PAD, HID_PAD)).astype(jnp.bfloat16)   # (256, 256)
    b3p = _pad_to(b3, (1, HID_PAD)).astype(jnp.float32)
    w4p = _pad_to(w4.T, (1, HID_PAD)).astype(jnp.float32)        # (1, 256) f32 row
    b4p = b4.astype(jnp.float32)                                 # (1, 1) f32
    return (w1p, b1p, w2p, b2p, w3p, b3p, w4p, b4p)


@functools.partial(jax.jit, static_argnames=("tile_b",))
def net_forward(x, prep, tile_b=2048):
    """x: (B, 79) float32 -> (B, 1) float32."""
    w1p, b1p, w2p, b2p, w3p, b3p, w4p, b4p = prep
    B = x.shape[0]

    # Batch tile: at most tile_b, at least 2 grid steps when B allows it
    # (dual-TC sharding on v7x), 16-row aligned for bf16 sublane packing,
    # never larger than the sublane-rounded batch itself.
    half_cover = _round_up(max(1, -(-B // 2)), 16)
    eff_tile = max(8, min(tile_b, half_cover, _round_up(B, 8)))
    grid = (pl.cdiv(B, eff_tile),)

    const = lambda shape: pl.BlockSpec(shape, lambda i: (0, 0))

    out = pl.pallas_call(
        mlp_kernel,
        out_shape=jax.ShapeDtypeStruct((B, 1), jnp.float32),
        grid=grid,
        in_specs=[
            pl.BlockSpec((eff_tile, IN_F), lambda i: (i, 0)),   # raw x tile (f32)
            const((IN_PAD, HID_PAD)),  const((1, HID_PAD)),     # w1, b1
            const((HID_PAD, HID_PAD)), const((1, HID_PAD)),     # w2, b2
            const((HID_PAD, HID_PAD)), const((1, HID_PAD)),     # w3, b3
            const((1, HID_PAD)),       const((1, 1)),           # w4 (row), b4
        ],
        out_specs=pl.BlockSpec((eff_tile, 1), lambda i: (i, 0)),
        scratch_shapes=[pltpu.VMEM((eff_tile, IN_PAD), jnp.bfloat16)],
        compiler_params=pltpu.CompilerParams(
            dimension_semantics=("parallel",),
            vmem_limit_bytes=48 * 1024 * 1024),
    )(x, w1p, b1p, w2p, b2p, w3p, b3p, w4p, b4p)

    return out


def xavier_uniform(key, fan_in, fan_out):
    # torch.nn.init.xavier_uniform_ : U(-a, a), a = sqrt(6 / (fan_in + fan_out))
    a = jnp.sqrt(6.0 / (fan_in + fan_out))
    # (in_features, out_features) layout so the kernel does x @ W.
    return jax.random.uniform(key, (fan_in, fan_out), jnp.float32, -a, a)


def init_params(key):
    dims = [(79, 178), (178, 178), (178, 178), (178, 1)]
    keys = jax.random.split(key, len(dims))
    params = []
    for k, (fi, fo) in zip(keys, dims):
        w = xavier_uniform(k, fi, fo)
        b = jnp.zeros((1, fo), jnp.float32)  # zeros_ bias init
        params.append((w, b))
    return params


def reference_forward_matched(x, params):
    # Mirrors the kernel's numerics: bf16 operands / f32 accumulation for
    # layers 1-3, pure f32 for the final 178->1 layer.
    (w1, b1), (w2, b2), (w3, b3), (w4, b4) = params
    z = x
    for (w, b) in ((w1, b1), (w2, b2), (w3, b3)):
        z = jnp.dot(z.astype(jnp.bfloat16), w.astype(jnp.bfloat16),
                    preferred_element_type=jnp.float32) + b
        z = jnp.maximum(z, 0.0)
    return jnp.dot(z, w4) + b4


def reference_forward_f32(x, params):
    z = x
    for i, (w, b) in enumerate(params):
        z = jnp.dot(z, w) + b
        if i < len(params) - 1:
            z = jnp.maximum(z, 0.0)
    return z


if __name__ == "__main__":
    key = jax.random.PRNGKey(0)
    kx, kp = jax.random.split(key)

    B = 8
    x = jax.random.normal(kx, (B, 79), jnp.float32)
    params = init_params(kp)
    prep = prepare_params(params)

    out = net_forward(x, prep)
    out = jax.block_until_ready(out)
    assert out.shape == (B, 1), out.shape

    # Tight check against a numerics-matched reference.
    ref_m = reference_forward_matched(x, params)
    assert jnp.allclose(out, ref_m, atol=5e-3, rtol=5e-3), (
        f"max abs diff vs matched ref {jnp.max(jnp.abs(out - ref_m))}")

    # Looser sanity check against the pure-f32 reference (bf16 operand rounding).
    ref_f32 = reference_forward_f32(x, params)
    assert jnp.allclose(out, ref_f32, atol=5e-2, rtol=5e-2), (
        f"max abs diff vs f32 ref {jnp.max(jnp.abs(out - ref_f32))}")

    print("KERNEL_OK")
</pallas_src>

<mosaic_0001>
module attributes {stable_mosaic.version = 11 : i64} {
  func.func @mlp_kernel(%arg0: i32, %arg1: memref<8x79xf32, #tpu.memory_space<vmem>>, %arg2: memref<128x256xbf16, #tpu.memory_space<vmem>>, %arg3: memref<1x256xf32, #tpu.memory_space<vmem>>, %arg4: memref<256x256xbf16, #tpu.memory_space<vmem>>, %arg5: memref<1x256xf32, #tpu.memory_space<vmem>>, %arg6: memref<256x256xbf16, #tpu.memory_space<vmem>>, %arg7: memref<1x256xf32, #tpu.memory_space<vmem>>, %arg8: memref<1x256xf32, #tpu.memory_space<vmem>>, %arg9: memref<1x1xf32, #tpu.memory_space<vmem>>, %arg10: memref<8x1xf32, #tpu.memory_space<vmem>>, %arg11: memref<8x128xbf16, #tpu.memory_space<vmem>>) attributes {dimension_semantics = [#tpu.dimension_semantics<parallel>], iteration_bounds = array<i64: 1>, scalar_prefetch = 0 : i64, scratch_operands = 1 : i64, tpu.core_type = #tpu.core_type<tc>, window_params = [{transform_indices = @transform_0, window_bounds = array<i64: 8, 79>}, {pipeline_mode = #tpu.pipeline_mode<synchronous>, transform_indices = @transform_1, window_bounds = array<i64: 128, 256>}, {pipeline_mode = #tpu.pipeline_mode<synchronous>, transform_indices = @transform_2, window_bounds = array<i64: 1, 256>}, {pipeline_mode = #tpu.pipeline_mode<synchronous>, transform_indices = @transform_3, window_bounds = array<i64: 256, 256>}, {pipeline_mode = #tpu.pipeline_mode<synchronous>, transform_indices = @transform_4, window_bounds = array<i64: 1, 256>}, {pipeline_mode = #tpu.pipeline_mode<synchronous>, transform_indices = @transform_5, window_bounds = array<i64: 256, 256>}, {pipeline_mode = #tpu.pipeline_mode<synchronous>, transform_indices = @transform_6, window_bounds = array<i64: 1, 256>}, {pipeline_mode = #tpu.pipeline_mode<synchronous>, transform_indices = @transform_7, window_bounds = array<i64: 1, 256>}, {pipeline_mode = #tpu.pipeline_mode<synchronous>, transform_indices = @transform_8, window_bounds = array<i64: 1, 1>}, {transform_indices = @transform_9, window_bounds = array<i64: 8, 1>}]} {
    %cst = arith.constant 0.000000e+00 : bf16
    %0 = vector.broadcast %cst : bf16 to vector<8x128xbf16>
    %c0 = arith.constant 0 : index
    %c0_0 = arith.constant 0 : index
    %1 = vector.load %arg11[%c0, %c0_0] : memref<8x128xbf16, #tpu.memory_space<vmem>>, vector<8x128xbf16>
    tpu.vector_store %arg11[%c0, %c0_0], %0 {strides = array<i32>} : memref<8x128xbf16, #tpu.memory_space<vmem>>, vector<8x128xbf16>,
    %c0_1 = arith.constant 0 : index
    %c0_2 = arith.constant 0 : index
    %2 = vector.load %arg1[%c0_1, %c0_2] : memref<8x79xf32, #tpu.memory_space<vmem>>, vector<8x79xf32>
    %3 = arith.truncf %2 : vector<8x79xf32> to vector<8x79xbf16>
    %c0_3 = arith.constant 0 : index
    %c0_4 = arith.constant 0 : index
    %4 = vector.load %arg11[%c0_3, %c0_4] : memref<8x128xbf16, #tpu.memory_space<vmem>>, vector<8x79xbf16>
    tpu.vector_store %arg11[%c0_3, %c0_4], %3 {strides = array<i32>} : memref<8x128xbf16, #tpu.memory_space<vmem>>, vector<8x79xbf16>,
    %c0_5 = arith.constant 0 : index
    %c0_6 = arith.constant 0 : index
    %5 = vector.load %arg11[%c0_5, %c0_6] : memref<8x128xbf16, #tpu.memory_space<vmem>>, vector<8x128xbf16>
    %c0_7 = arith.constant 0 : index
    %c0_8 = arith.constant 0 : index
    %6 = vector.load %arg2[%c0_7, %c0_8] : memref<128x256xbf16, #tpu.memory_space<vmem>>, vector<128x256xbf16>
    %cst_9 = arith.constant dense<0.000000e+00> : vector<8x256xf32>
    %7 = tpu.matmul %5, %6, %cst_9 {dimension_numbers = #tpu.dot_dimension_numbers<[1], [0], [0], [1], [0, 0, 1, 1], [], []>} : vector<8x128xbf16>, vector<128x256xbf16>, vector<8x256xf32> -> vector<8x256xf32>
    %c0_10 = arith.constant 0 : index
    %c0_11 = arith.constant 0 : index
    %8 = vector.load %arg3[%c0_10, %c0_11] : memref<1x256xf32, #tpu.memory_space<vmem>>, vector<1x256xf32>
    %9 = vector.broadcast %8 : vector<1x256xf32> to vector<8x256xf32>
    %10 = arith.addf %7, %9 : vector<8x256xf32>
    %cst_12 = arith.constant 0.000000e+00 : f32
    %11 = vector.broadcast %cst_12 : f32 to vector<8x256xf32>
    %12 = arith.maximumf %10, %11 : vector<8x256xf32>
    %13 = arith.truncf %12 : vector<8x256xf32> to vector<8x256xbf16>
    %c0_13 = arith.constant 0 : index
    %c0_14 = arith.constant 0 : index
    %14 = vector.load %arg4[%c0_13, %c0_14] : memref<256x256xbf16, #tpu.memory_space<vmem>>, vector<256x256xbf16>
    %cst_15 = arith.constant dense<0.000000e+00> : vector<8x256xf32>
    %15 = tpu.matmul %13, %14, %cst_15 {dimension_numbers = #tpu.dot_dimension_numbers<[1], [0], [0], [1], [0, 0, 1, 1], [], []>} : vector<8x256xbf16>, vector<256x256xbf16>, vector<8x256xf32> -> vector<8x256xf32>
    %c0_16 = arith.constant 0 : index
    %c0_17 = arith.constant 0 : index
    %16 = vector.load %arg5[%c0_16, %c0_17] : memref<1x256xf32, #tpu.memory_space<vmem>>, vector<1x256xf32>
    %17 = vector.broadcast %16 : vector<1x256xf32> to vector<8x256xf32>
    %18 = arith.addf %15, %17 : vector<8x256xf32>
    %cst_18 = arith.constant 0.000000e+00 : f32
    %19 = vector.broadcast %cst_18 : f32 to vector<8x256xf32>
    %20 = arith.maximumf %18, %19 : vector<8x256xf32>
    %21 = arith.truncf %20 : vector<8x256xf32> to vector<8x256xbf16>
    %c0_19 = arith.constant 0 : index
    %c0_20 = arith.constant 0 : index
    %22 = vector.load %arg6[%c0_19, %c0_20] : memref<256x256xbf16, #tpu.memory_space<vmem>>, vector<256x256xbf16>
    %cst_21 = arith.constant dense<0.000000e+00> : vector<8x256xf32>
    %23 = tpu.matmul %21, %22, %cst_21 {dimension_numbers = #tpu.dot_dimension_numbers<[1], [0], [0], [1], [0, 0, 1, 1], [], []>} : vector<8x256xbf16>, vector<256x256xbf16>, vector<8x256xf32> -> vector<8x256xf32>
    %c0_22 = arith.constant 0 : index
    %c0_23 = arith.constant 0 : index
    %24 = vector.load %arg7[%c0_22, %c0_23] : memref<1x256xf32, #tpu.memory_space<vmem>>, vector<1x256xf32>
    %25 = vector.broadcast %24 : vector<1x256xf32> to vector<8x256xf32>
    %26 = arith.addf %23, %25 : vector<8x256xf32>
    %cst_24 = arith.constant 0.000000e+00 : f32
    %27 = vector.broadcast %cst_24 : f32 to vector<8x256xf32>
    %28 = arith.maximumf %26, %27 : vector<8x256xf32>
    %c0_25 = arith.constant 0 : index
    %c0_26 = arith.constant 0 : index
    %29 = vector.load %arg8[%c0_25, %c0_26] : memref<1x256xf32, #tpu.memory_space<vmem>>, vector<1x256xf32>
    %30 = vector.broadcast %29 : vector<1x256xf32> to vector<8x256xf32>
    %31 = arith.mulf %28, %30 : vector<8x256xf32>
    %cst_27 = arith.constant dense<0.000000e+00> : vector<8xf32>
    %32 = vector.multi_reduction <add>, %31, %cst_27 [1] : vector<8x256xf32> to vector<8xf32>
    %33 = vector.shape_cast %32 : vector<8xf32> to vector<8x1xf32>
    %c0_28 = arith.constant 0 : index
    %c0_29 = arith.constant 0 : index
    %34 = vector.load %arg9[%c0_28, %c0_29] : memref<1x1xf32, #tpu.memory_space<vmem>>, vector<1x1xf32>
    %35 = vector.broadcast %34 : vector<1x1xf32> to vector<8x1xf32>
    %36 = arith.addf %33, %35 : vector<8x1xf32>
    %c0_30 = arith.constant 0 : index
    %c0_31 = arith.constant 0 : index
    %37 = vector.load %arg10[%c0_30, %c0_31] : memref<8x1xf32, #tpu.memory_space<vmem>>, vector<8x1xf32>
    tpu.vector_store %arg10[%c0_30, %c0_31], %36 {strides = array<i32>} : memref<8x1xf32, #tpu.memory_space<vmem>>, vector<8x1xf32>,
    return
  }
  func.func @transform_0(%arg0: i32) -> (i32, i32) {
    %c0_i32 = arith.constant 0 : i32
    %c0_i32_0 = arith.constant 0 : i32
    return %arg0, %c0_i32 : i32, i32
  }
  func.func @transform_1(%arg0: i32) -> (i32, i32) {
    %c0_i32 = arith.constant 0 : i32
    %c0_i32_0 = arith.constant 0 : i32
    %c0_i32_1 = arith.constant 0 : i32
    return %c0_i32, %c0_i32_0 : i32, i32
  }
  func.func @transform_2(%arg0: i32) -> (i32, i32) {
    %c0_i32 = arith.constant 0 : i32
    %c0_i32_0 = arith.constant 0 : i32
    %c0_i32_1 = arith.constant 0 : i32
    return %c0_i32, %c0_i32_0 : i32, i32
  }
  func.func @transform_3(%arg0: i32) -> (i32, i32) {
    %c0_i32 = arith.constant 0 : i32
    %c0_i32_0 = arith.constant 0 : i32
    %c0_i32_1 = arith.constant 0 : i32
    return %c0_i32, %c0_i32_0 : i32, i32
  }
  func.func @transform_4(%arg0: i32) -> (i32, i32) {
    %c0_i32 = arith.constant 0 : i32
    %c0_i32_0 = arith.constant 0 : i32
    %c0_i32_1 = arith.constant 0 : i32
    return %c0_i32, %c0_i32_0 : i32, i32
  }
  func.func @transform_5(%arg0: i32) -> (i32, i32) {
    %c0_i32 = arith.constant 0 : i32
    %c0_i32_0 = arith.constant 0 : i32
    %c0_i32_1 = arith.constant 0 : i32
    return %c0_i32, %c0_i32_0 : i32, i32
  }
  func.func @transform_6(%arg0: i32) -> (i32, i32) {
    %c0_i32 = arith.constant 0 : i32
    %c0_i32_0 = arith.constant 0 : i32
    %c0_i32_1 = arith.constant 0 : i32
    return %c0_i32, %c0_i32_0 : i32, i32
  }
  func.func @transform_7(%arg0: i32) -> (i32, i32) {
    %c0_i32 = arith.constant 0 : i32
    %c0_i32_0 = arith.constant 0 : i32
    %c0_i32_1 = arith.constant 0 : i32
    return %c0_i32, %c0_i32_0 : i32, i32
  }
  func.func @transform_8(%arg0: i32) -> (i32, i32) {
    %c0_i32 = arith.constant 0 : i32
    %c0_i32_0 = arith.constant 0 : i32
    %c0_i32_1 = arith.constant 0 : i32
    return %c0_i32, %c0_i32_0 : i32, i32
  }
  func.func @transform_9(%arg0: i32) -> (i32, i32) {
    %c0_i32 = arith.constant 0 : i32
    %c0_i32_0 = arith.constant 0 : i32
    return %arg0, %c0_i32 : i32, i32
  }
}

</mosaic_0001>

<bundles_post_ra>
// kernel: net_forward.1
= control target key start
LH: loop header
LB: loop body
LE: loop exit
PB: predicated region body
PF: predicated region fallthrough
CT: control target
= control target key end

     0   :  { %s1211_s0 = inlined_call_operand.hbm [shape: f32[8,79], index: 0, kind: input, shape index: {}]   ;;  %s1212_s1 = inlined_call_operand.hbm [shape: bf16[128,256], index: 1, kind: input, shape index: {}]   ;;  %s1213_s2 = inlined_call_operand.vmem [shape: f32[1,256], index: 2, kind: input, shape index: {}]   ;;  %s1214_s3 = inlined_call_operand.hbm [shape: bf16[256,256], index: 3, kind: input, shape index: {}]   ;;  %s1215_s4 = inlined_call_operand.vmem [shape: f32[1,256], index: 4, kind: input, shape index: {}]   ;;  %s1216_s5 = inlined_call_operand.hbm [shape: bf16[256,256], index: 5, kind: input, shape index: {}]   ;;  %s1217_s6 = inlined_call_operand.vmem [shape: f32[1,256], index: 6, kind: input, shape index: {}]   ;;  %s1218_s7 = inlined_call_operand.vmem [shape: f32[1,256], index: 7, kind: input, shape index: {}]   ;;  %s1219_s8 = inlined_call_operand.<no memory space> [shape: f32[1,1], index: 8, kind: input, shape index: {}]   ;;  %s1220_s9 = inlined_call_operand.vmem [shape: f32[8,1], index: 9, kind: output, shape index: {}]  }
   0x1   :  { %v14_v0 = vstv %s1219_s8 }
   0x2   :  { %15 = vst [vmem:[#allocation3] sm:$0x1] %v14_v0 }
   0x3   :  { %16 = vsyncpa [#allocation5], 0 }
   0x4   :  { %17 = vsyncpa [#allocation7], 0 }
   0x5   :  { %18 = vsyncpa [#allocation10], 0  ;;  %s1079_s11 = smov [#allocation6]   ;;  %s985_s15 = scalar_lea.hbm %s1212_s1, 2048 }
   0x6   :  { %s34_s12 = sshll.u32 %s1079_s11, 4  ;;  %p986_p0 = scmp.ne.s32.totalorder %s1212_s1, %s985_s15  ;;  %s35_s12 = int_to_ptr.vmem [resolvable:$true] %s34_s12 }
   0x7   :  { %p989_p1 = scmp.lt.u32.totalorder %s985_s15, %s1212_s1 }
   0x9   :  { %p991_p2 = pnand %p989_p1, %p986_p0 }
   0xb   :  { %994 = shalt.err (!%p991_p2)
}
   0xc   :  { %s995_s8 = scalar_lea.vmem %s35_s12, 2048  ;;  %p1000_p4 = scmp.lt.s32.totalorder %s35_s12, %s35_s12 }
   0xd   :  { %p996_p3 = scmp.ne.s32.totalorder %s35_s12, %s995_s8  ;;  %p1001_p5 = scmp.lt.s32.totalorder %s995_s8, %s995_s8 }
   0xf   :  { %p1002_p6 = por %p1001_p5, %p1000_p4 }
  0x11   :  { %p1003_p7 = pnand %p1002_p6, %p996_p3 }
  0x13   :  { %1006 = shalt.err (!%p1003_p7)
}
  0x14   :  { %s1080_s20 = smov 128   ;;  %s1081_s21 = smov 8  }
  0x15   :  { %40 = dma.hbm_to_vmem [thread:$0]  %s1212_s1, 2048, %s35_s12, [#allocation7], %s1080_s20, %s1080_s20, %s1081_s21  }
  0x16   :  { %s1082_s24 = smov [#allocation4]   ;;  %s1083_s26 = smov [#allocation8]  }
  0x17   :  { %s25_s25 = sshll.u32 %s1082_s24, 4  ;;  %s48_s27 = sshll.u32 %s1083_s26, 4  ;;  %s26_s25 = int_to_ptr.vmem [resolvable:$true] %s25_s25  ;;  %s49_s27 = int_to_ptr.vmem [resolvable:$true] %s48_s27 }
  0x18   :  { %s1007_s30 = scalar_lea.hbm %s1211_s0, 128 }
  0x19   :  { %p1008_p8 = scmp.ne.s32.totalorder %s1211_s0, %s1007_s30  ;;  %p1011_p9 = scmp.lt.u32.totalorder %s1007_s30, %s1211_s0 }
  0x1b   :  { %p1013_p10 = pnand %p1011_p9, %p1008_p8 }
  0x1d   :  { %1016 = shalt.err (!%p1013_p10)
}
  0x1e   :  { %s1017_s1 = scalar_lea.vmem %s26_s25, 128  ;;  %p1022_p12 = scmp.lt.s32.totalorder %s26_s25, %s26_s25 }
  0x1f   :  { %p1018_p11 = scmp.ne.s32.totalorder %s26_s25, %s1017_s1  ;;  %p1023_p13 = scmp.lt.s32.totalorder %s1017_s1, %s1017_s1 }
  0x21   :  { %p1024_p0 = por %p1023_p13, %p1022_p12 }
  0x23   :  { %p1025_p1 = pnand %p1024_p0, %p1018_p11 }
  0x25   :  { %1028 = shalt.err (!%p1025_p1)
}
  0x26   :  { %28 = dma.hbm_to_vmem [thread:$0]  %s1211_s0, 128, %s26_s25, [#allocation5]  }
  0x27   :  { %s1029_s18 = scalar_lea.hbm %s1214_s3, 4096 }
  0x28   :  { %p1030_p2 = scmp.ne.s32.totalorder %s1214_s3, %s1029_s18  ;;  %p1033_p3 = scmp.lt.u32.totalorder %s1029_s18, %s1214_s3 }
  0x2a   :  { %p1035_p4 = pnand %p1033_p3, %p1030_p2 }
  0x2c   :  { %1038 = shalt.err (!%p1035_p4)
}
  0x2d   :  { %s1039_s24 = scalar_lea.vmem %s49_s27, 4096  ;;  %p1044_p6 = scmp.lt.s32.totalorder %s49_s27, %s49_s27 }
  0x2e   :  { %p1040_p5 = scmp.ne.s32.totalorder %s49_s27, %s1039_s24  ;;  %p1045_p7 = scmp.lt.s32.totalorder %s1039_s24, %s1039_s24 }
  0x30   :  { %p1046_p8 = por %p1045_p7, %p1044_p6 }
  0x32   :  { %p1047_p9 = pnand %p1046_p8, %p1040_p5 }
  0x34   :  { %1050 = shalt.err (!%p1047_p9)
}
  0x35   :  { %54 = dma.hbm_to_vmem [thread:$0]  %s1214_s3, 4096, %s49_s27, [#allocation7], %s1080_s20, %s1080_s20, %s1081_s21  }
  0x36   :  { %s1084_s26 = smov [#allocation9]   ;;  %s1051_s10 = scalar_lea.hbm %s1216_s5, 4096 }
  0x37   :  { %s62_s28 = sshll.u32 %s1084_s26, 4  ;;  %p1052_p10 = scmp.ne.s32.totalorder %s1216_s5, %s1051_s10  ;;  %s63_s28 = int_to_ptr.vmem [resolvable:$true] %s62_s28 }
  0x38   :  { %p1055_p11 = scmp.lt.u32.totalorder %s1051_s10, %s1216_s5 }
  0x3a   :  { %p1057_p12 = pnand %p1055_p11, %p1052_p10 }
  0x3c   :  { %1060 = shalt.err (!%p1057_p12)
}
  0x3d   :  { %s1061_s12 = scalar_lea.vmem %s63_s28, 4096  ;;  %p1066_p0 = scmp.lt.s32.totalorder %s63_s28, %s63_s28 }
  0x3e   :  { %p1062_p13 = scmp.ne.s32.totalorder %s63_s28, %s1061_s12  ;;  %p1067_p1 = scmp.lt.s32.totalorder %s1061_s12, %s1061_s12 }
  0x40   :  { %p1068_p2 = por %p1067_p1, %p1066_p0 }
  0x42   :  { %p1069_p3 = pnand %p1068_p2, %p1062_p13 }
  0x44   :  { %1072 = shalt.err (!%p1069_p3)
}
  0x45   :  { %68 = dma.hbm_to_vmem [thread:$0]  %s1216_s5, 4096, %s63_s28, [#allocation10], %s1080_s20, %s1080_s20, %s1081_s21  }
  0x46   :  { %1073 = dma.done.wait [#allocation5], 128  }
  0x47   :  { %1074 = vsyncadd [#allocation5], 4294967168 }
  0x48   :  { %1075 = dma.done.wait [#allocation7], 6144  }
  0x49   :  { %1076 = vsyncadd [#allocation7], 4294961152 }
  0x4a   :  { %1077 = dma.done.wait [#allocation10], 4096  }
  0x4b   :  { %1078 = vsyncadd [#allocation10], 4294963200  ;;  %v1085_v1 = vmov 0   ;;  %v865_v2 = vld [vmem:[#allocation6 + $0x4] ss:$8 sps:$4 sm:$0xff]   ;;  %v89_v11 = vld [vmem:[#allocation4] sm:$0xff] }
  0x4c   :  { %88 = vst [vmem:[#allocation2] sm:$0xf] %v1085_v1  ;;  %234 = vmatprep.mubr.bf16.mxu0 %v1085_v1  ;;  %v867_v3 = vld [vmem:[#allocation6] ss:$8 sps:$4 sm:$0xff]   ;;  %202 = vmatprep.subr.bf16.mxu0 %v865_v2  ;;  %v868_v4 = vld [vmem:[#allocation6 + $0x14] ss:$8 sps:$4 sm:$0xff]   ;;  %v90_v12 = vpack.c.bf16 %v89_v11, %v89_v11 }
  0x4d   :  { %203 = vmatpush1.bf16.msra.mxu0 %v867_v3  ;;  %v870_v5 = vld [vmem:[#allocation6 + $0x10] ss:$8 sps:$4 sm:$0xff]   ;;  %v871_v6 = vld [vmem:[#allocation6 + $0x24] ss:$8 sps:$4 sm:$0xff]   ;;  %v873_v7 = vld [vmem:[#allocation6 + $0x20] ss:$8 sps:$4 sm:$0xff]  }
  0x4e   :  { %204 = vmatprep.subr.bf16.mxu0 %v868_v4  ;;  %v874_v8 = vld [vmem:[#allocation6 + $0x34] ss:$8 sps:$4 sm:$0xff]   ;;  %v876_v9 = vld [vmem:[#allocation6 + $0x30] ss:$8 sps:$4 sm:$0xff]   ;;  %v877_v10 = vld [vmem:[#allocation6 + $0x44] ss:$8 sps:$4 sm:$0xff]  }
  0x4f   :  { %vm91_vm0 = vcmask 642048   ;;  %v889_v13 = vld [vmem:[#allocation8 + $0x4] ss:$8 sps:$4 sm:$0xff]   ;;  %v891_v14 = vld [vmem:[#allocation8] ss:$8 sps:$4 sm:$0xff]   ;;  %vm768_vm1 = vcmask 7168  }
  0x50   :  { %92 = vst.msk [vmem:[#allocation2] sm:$0xf] %vm91_vm0, %v90_v12  ;;  %451 = vmatprep.subr.bf16.mxu1 %v889_v13  ;;  %v892_v15 = vld [vmem:[#allocation8 + $0x14] ss:$8 sps:$4 sm:$0xff]   ;;  %v879_v16 = vld [vmem:[#allocation6 + $0x40] ss:$8 sps:$4 sm:$0xff]  }
  0x51   :  { %205 = vmatpush1.bf16.msra.mxu0 %v870_v5  ;;  %452 = vmatpush1.bf16.msra.mxu1 %v891_v14  ;;  %v894_v17 = vld [vmem:[#allocation8 + $0x10] ss:$8 sps:$4 sm:$0xff]   ;;  %v895_v18 = vld [vmem:[#allocation8 + $0x24] ss:$8 sps:$4 sm:$0xff]   ;;  %v880_v19 = vld [vmem:[#allocation6 + $0x54] ss:$8 sps:$4 sm:$0xff]  }
  0x52   :  { %206 = vmatprep.subr.bf16.mxu0 %v871_v6  ;;  %453 = vmatprep.subr.bf16.mxu1 %v892_v15  ;;  %v882_v20 = vld [vmem:[#allocation6 + $0x50] ss:$8 sps:$4 sm:$0xff]   ;;  %v897_v21 = vld [vmem:[#allocation8 + $0x20] ss:$8 sps:$4 sm:$0xff]   ;;  %v898_v22 = vld [vmem:[#allocation8 + $0x34] ss:$8 sps:$4 sm:$0xff]  }
  0x53   :  { %v883_v23 = vld [vmem:[#allocation6 + $0x64] ss:$8 sps:$4 sm:$0xff]   ;;  %v885_v24 = vld [vmem:[#allocation6 + $0x60] ss:$8 sps:$4 sm:$0xff]   ;;  %v900_v25 = vld [vmem:[#allocation8 + $0x30] ss:$8 sps:$4 sm:$0xff]  }
  0x54   :  { %v901_v26 = vld [vmem:[#allocation8 + $0x44] ss:$8 sps:$4 sm:$0xff]   ;;  %v886_v27 = vld [vmem:[#allocation6 + $0x74] ss:$8 sps:$4 sm:$0xff]   ;;  %v888_v28 = vld [vmem:[#allocation6 + $0x70] ss:$8 sps:$4 sm:$0xff]  }
  0x55   :  { %207 = vmatpush1.bf16.msra.mxu0 %v873_v7  ;;  %454 = vmatpush1.bf16.msra.mxu1 %v894_v17  ;;  %v903_v29 = vld [vmem:[#allocation8 + $0x40] ss:$8 sps:$4 sm:$0xff]   ;;  %v904_v30 = vld [vmem:[#allocation8 + $0x54] ss:$8 sps:$4 sm:$0xff]   ;;  %v906_v31 = vld [vmem:[#allocation8 + $0x50] ss:$8 sps:$4 sm:$0xff]   ;;  %v112_v17 = vlaneseq }
  0x56   :  { %208 = vmatprep.subr.bf16.mxu0 %v874_v8  ;;  %455 = vmatprep.subr.bf16.mxu1 %v895_v18  ;;  %v907_v32 = vld [vmem:[#allocation8 + $0x64] ss:$8 sps:$4 sm:$0xff]   ;;  %v909_v34 = vld [vmem:[#allocation8 + $0x60] ss:$8 sps:$4 sm:$0xff]   ;;  %v910_v35 = vld [vmem:[#allocation8 + $0x74] ss:$8 sps:$4 sm:$0xff]  }
  0x57   :  { %v93_v33 = vld [vmem:[#allocation2] sm:$0xf]  ;;  %v913_v37 = vld [vmem:[#allocation8 + $0x84] ss:$8 sps:$4 sm:$0xff]   ;;  %v915_v38 = vld [vmem:[#allocation8 + $0x80] ss:$8 sps:$4 sm:$0xff]  }
  0x58   :  { %v912_v36 = vld [vmem:[#allocation8 + $0x70] ss:$8 sps:$4 sm:$0xff]   ;;  %v916_v39 = vld [vmem:[#allocation8 + $0x94] ss:$8 sps:$4 sm:$0xff]   ;;  %v919_v41 = vld [vmem:[#allocation8 + $0xa4] ss:$8 sps:$4 sm:$0xff]  }
  0x59   :  { %209 = vmatpush1.bf16.msra.mxu0 %v876_v9  ;;  %456 = vmatpush1.bf16.msra.mxu1 %v897_v21  ;;  %v918_v40 = vld [vmem:[#allocation8 + $0x90] ss:$8 sps:$4 sm:$0xff]   ;;  %v921_v42 = vld [vmem:[#allocation8 + $0xa0] ss:$8 sps:$4 sm:$0xff]   ;;  %v922_v43 = vld [vmem:[#allocation8 + $0xb4] ss:$8 sps:$4 sm:$0xff]  }
  0x5a   :  { %210 = vmatprep.subr.bf16.mxu0 %v877_v10  ;;  %457 = vmatprep.subr.bf16.mxu1 %v898_v22  ;;  %v924_v44 = vld [vmem:[#allocation8 + $0xb0] ss:$8 sps:$4 sm:$0xff]   ;;  %v925_v45 = vld [vmem:[#allocation8 + $0xc4] ss:$8 sps:$4 sm:$0xff]   ;;  %v927_v46 = vld [vmem:[#allocation8 + $0xc0] ss:$8 sps:$4 sm:$0xff]  }
  0x5b   :  { %v928_v47 = vld [vmem:[#allocation8 + $0xd4] ss:$8 sps:$4 sm:$0xff]   ;;  %v930_v48 = vld [vmem:[#allocation8 + $0xd0] ss:$8 sps:$4 sm:$0xff]   ;;  %v931_v49 = vld [vmem:[#allocation8 + $0xe4] ss:$8 sps:$4 sm:$0xff]  }
  0x5c   :  { %v933_v50 = vld [vmem:[#allocation8 + $0xe0] ss:$8 sps:$4 sm:$0xff]   ;;  %v934_v51 = vld [vmem:[#allocation8 + $0xf4] ss:$8 sps:$4 sm:$0xff]   ;;  %v936_v52 = vld [vmem:[#allocation8 + $0xf0] ss:$8 sps:$4 sm:$0xff]  }
  0x5d   :  { %211 = vmatpush1.bf16.msra.mxu0 %v879_v16  ;;  %458 = vmatpush1.bf16.msra.mxu1 %v900_v25  ;;  %v937_v53 = vld [vmem:[#allocation9] ss:$8 sps:$4 sm:$0xff]   ;;  %v939_v54 = vld [vmem:[#allocation9 + $0x4] ss:$8 sps:$4 sm:$0xff]   ;;  %v942_v55 = vld [vmem:[#allocation9 + $0x14] ss:$8 sps:$4 sm:$0xff]  }
  0x5e   :  { %212 = vmatprep.subr.bf16.mxu0 %v880_v19  ;;  %459 = vmatprep.subr.bf16.mxu1 %v901_v26  ;;  %v940_v56 = vld [vmem:[#allocation9 + $0x10] ss:$8 sps:$4 sm:$0xff]   ;;  %v945_v57 = vld [vmem:[#allocation9 + $0x24] ss:$8 sps:$4 sm:$0xff]   ;;  %v943_v58 = vld [vmem:[#allocation9 + $0x20] ss:$8 sps:$4 sm:$0xff]  }
  0x5f   :  { %v948_v59 = vld [vmem:[#allocation9 + $0x34] ss:$8 sps:$4 sm:$0xff]   ;;  %v946_v60 = vld [vmem:[#allocation9 + $0x30] ss:$8 sps:$4 sm:$0xff]   ;;  %v951_v61 = vld [vmem:[#allocation9 + $0x44] ss:$8 sps:$4 sm:$0xff]  }
  0x60   :  { %v949_v62 = vld [vmem:[#allocation9 + $0x40] ss:$8 sps:$4 sm:$0xff]   ;;  %v954_v63 = vld [vmem:[#allocation9 + $0x54] ss:$8 sps:$4 sm:$0xff]   ;;  %v952_v0 = vld [vmem:[#allocation9 + $0x50] ss:$8 sps:$4 sm:$0xff]  }
  0x61   :  { %213 = vmatpush1.bf16.msra.mxu0 %v882_v20  ;;  %460 = vmatpush1.bf16.msra.mxu1 %v903_v29  ;;  %v957_v1 = vld [vmem:[#allocation9 + $0x64] ss:$8 sps:$4 sm:$0xff]   ;;  %v955_v2 = vld [vmem:[#allocation9 + $0x60] ss:$8 sps:$4 sm:$0xff]   ;;  %v960_v3 = vld [vmem:[#allocation9 + $0x74] ss:$8 sps:$4 sm:$0xff]  }
  0x62   :  { %214 = vmatprep.subr.bf16.mxu0 %v883_v23  ;;  %461 = vmatprep.subr.bf16.mxu1 %v904_v30  ;;  %v958_v4 = vld [vmem:[#allocation9 + $0x70] ss:$8 sps:$4 sm:$0xff]   ;;  %v963_v5 = vld [vmem:[#allocation9 + $0x84] ss:$8 sps:$4 sm:$0xff]   ;;  %v961_v6 = vld [vmem:[#allocation9 + $0x80] ss:$8 sps:$4 sm:$0xff]  }
  0x63   :  { %v966_v7 = vld [vmem:[#allocation9 + $0x94] ss:$8 sps:$4 sm:$0xff]   ;;  %v964_v8 = vld [vmem:[#allocation9 + $0x90] ss:$8 sps:$4 sm:$0xff]   ;;  %v969_v9 = vld [vmem:[#allocation9 + $0xa4] ss:$8 sps:$4 sm:$0xff]  }
  0x64   :  { %v967_v10 = vld [vmem:[#allocation9 + $0xa0] ss:$8 sps:$4 sm:$0xff]   ;;  %v972_v11 = vld [vmem:[#allocation9 + $0xb4] ss:$8 sps:$4 sm:$0xff]   ;;  %v970_v12 = vld [vmem:[#allocation9 + $0xb0] ss:$8 sps:$4 sm:$0xff]  }
  0x65   :  { %215 = vmatpush1.bf16.msra.mxu0 %v885_v24  ;;  %462 = vmatpush1.bf16.msra.mxu1 %v906_v31  ;;  %v975_v13 = vld [vmem:[#allocation9 + $0xc4] ss:$8 sps:$4 sm:$0xff]   ;;  %v973_v14 = vld [vmem:[#allocation9 + $0xc0] ss:$8 sps:$4 sm:$0xff]   ;;  %v978_v15 = vld [vmem:[#allocation9 + $0xd4] ss:$8 sps:$4 sm:$0xff]  }
  0x66   :  { %216 = vmatprep.subr.bf16.mxu0 %v886_v27  ;;  %463 = vmatprep.subr.bf16.mxu1 %v907_v32  ;;  %v976_v16 = vld [vmem:[#allocation9 + $0xd0] ss:$8 sps:$4 sm:$0xff]   ;;  %v113_v18 = vshrl.u32 %v112_v17, 7 }
  0x67   :  { %v110_v20 = vld [vmem:[%s1213_s2] sm:$0x3] }
  0x68   :  { %v114_v19 = vsub.s32 0, %v113_v18  ;;  %v118_v21 = vsub.s32 1, %v113_v18 }
  0x69   :  { %217 = vmatpush1.bf16.msra.mxu0 %v888_v28  ;;  %464 = vmatpush1.bf16.msra.mxu1 %v909_v34  ;;  %v981_v34 = vld [vmem:[#allocation9 + $0xe4] ss:$8 sps:$4 sm:$0xff]  }
  0x6a   :  { %465 = vmatprep.subr.bf16.mxu1 %v910_v35  ;;  %700 = vmatprep.subr.bf16.mxu0 %v939_v54  ;;  %v115_v22 = vrot.slane %v110_v20, %v114_v19  ;;  %v119_v23 = vrot.slane %v110_v20, %v118_v21  ;;  %v979_v35 = vld [vmem:[#allocation9 + $0xe0] ss:$8 sps:$4 sm:$0xff]   ;;  %v743_v54 = vld [vmem:[%s1218_s7] sm:$0x3] }
  0x6c   :  { %235 = vmatmul.mubr.bf16.vlgmr.msra.gmra.mrb[0].mxu0 %v93_v33 }
  0x6d   :  { %466 = vmatpush1.bf16.msra.mxu1 %v912_v36  ;;  %701 = vmatpush1.bf16.msra.mxu0 %v937_v53  ;;  %v984_v36 = vld [vmem:[#allocation9 + $0xf4] ss:$8 sps:$4 sm:$0xff]  }
  0x6e   :  { %467 = vmatprep.subr.bf16.mxu1 %v913_v37  ;;  %702 = vmatprep.subr.bf16.mxu0 %v942_v55  ;;  %v982_v37 = vld [vmem:[#allocation9 + $0xf0] ss:$8 sps:$4 sm:$0xff]  }
  0x71   :  { %468 = vmatpush1.bf16.msra.mxu1 %v915_v38  ;;  %703 = vmatpush1.bf16.msra.mxu0 %v940_v56  ;;  %v279_v38 = vld [vmem:[%s1215_s4] sm:$0x3] }
  0x72   :  { %469 = vmatprep.subr.bf16.mxu1 %v916_v39  ;;  %704 = vmatprep.subr.bf16.mxu0 %v945_v57  ;;  %v284_v39 = vrot.slane %v279_v38, %v114_v19 }
  0x75   :  { %470 = vmatpush1.bf16.msra.mxu1 %v918_v40  ;;  %705 = vmatpush1.bf16.msra.mxu0 %v943_v58  ;;  %v288_v40 = vrot.slane %v279_v38, %v118_v21  ;;  %v748_v58 = vrot.slane %v743_v54, %v114_v19 }
  0x76   :  { %471 = vmatprep.subr.bf16.mxu1 %v919_v41  ;;  %706 = vmatprep.subr.bf16.mxu0 %v948_v59 }
  0x79   :  { %472 = vmatpush1.bf16.msra.mxu1 %v921_v42  ;;  %707 = vmatpush1.bf16.msra.mxu0 %v946_v60 }
  0x7a   :  { %473 = vmatprep.subr.bf16.mxu1 %v922_v43  ;;  %708 = vmatprep.subr.bf16.mxu0 %v951_v61  ;;  %v752_v61 = vrot.slane %v743_v54, %v118_v21 }
  0x7d   :  { %474 = vmatpush1.bf16.msra.mxu1 %v924_v44  ;;  %709 = vmatpush1.bf16.msra.mxu0 %v949_v62 }
  0x7e   :  { %475 = vmatprep.subr.bf16.mxu1 %v925_v45  ;;  %710 = vmatprep.subr.bf16.mxu0 %v954_v63 }
  0x81   :  { %476 = vmatpush1.bf16.msra.mxu1 %v927_v46  ;;  %711 = vmatpush1.bf16.msra.mxu0 %v952_v0 }
  0x82   :  { %477 = vmatprep.subr.bf16.mxu1 %v928_v47  ;;  %712 = vmatprep.subr.bf16.mxu0 %v957_v1 }
  0x85   :  { %478 = vmatpush1.bf16.msra.mxu1 %v930_v48  ;;  %713 = vmatpush1.bf16.msra.mxu0 %v955_v2 }
  0x86   :  { %479 = vmatprep.subr.bf16.mxu1 %v931_v49  ;;  %714 = vmatprep.subr.bf16.mxu0 %v960_v3 }
  0x89   :  { %480 = vmatpush1.bf16.msra.mxu1 %v933_v50  ;;  %715 = vmatpush1.bf16.msra.mxu0 %v958_v4  ;;  %v857_v4 = vld [vmem:[#allocation3] ss:$0 sm:$0xff] }
  0x8a   :  { %481 = vmatprep.subr.bf16.mxu1 %v934_v51  ;;  %716 = vmatprep.subr.bf16.mxu0 %v963_v5  ;;  %v528_v51 = vld [vmem:[%s1217_s6] sm:$0x3] }
  0x8b   :  { %v537_v53 = vrot.slane %v528_v51, %v118_v21 }
  0x8d   :  { %482 = vmatpush1.bf16.msra.mxu1 %v936_v52  ;;  %717 = vmatpush1.bf16.msra.mxu0 %v961_v6  ;;  %v533_v52 = vrot.slane %v528_v51, %v114_v19 }
  0x8e   :  { %718 = vmatprep.subr.bf16.mxu0 %v966_v7 }
  0x91   :  { %719 = vmatpush1.bf16.msra.mxu0 %v964_v8 }
  0x92   :  { %720 = vmatprep.subr.bf16.mxu0 %v969_v9 }
  0x95   :  { %721 = vmatpush1.bf16.msra.mxu0 %v967_v10 }
  0x96   :  { %722 = vmatprep.subr.bf16.mxu0 %v972_v11 }
  0x99   :  { %723 = vmatpush1.bf16.msra.mxu0 %v970_v12 }
  0x9a   :  { %724 = vmatprep.subr.bf16.mxu0 %v975_v13 }
  0x9d   :  { %725 = vmatpush1.bf16.msra.mxu0 %v973_v14 }
  0x9e   :  { %726 = vmatprep.subr.bf16.mxu0 %v978_v15 }
  0xa1   :  { %727 = vmatpush1.bf16.msra.mxu0 %v976_v16 }
  0xa2   :  { %728 = vmatprep.subr.bf16.mxu0 %v981_v34 }
  0xa5   :  { %729 = vmatpush1.bf16.msra.mxu0 %v979_v35 }
  0xa6   :  { %730 = vmatprep.subr.bf16.mxu0 %v984_v36 }
  0xa9   :  { %731 = vmatpush1.bf16.msra.mxu0 %v982_v37 }
 0x13f   :  { %v236_v24 = vpop.f32.mrb[0].mxu0 }
 0x140   :  { %v237_v25 = vadd.f32 %v236_v24, %v115_v22  ;;  %v238_v26 = vpop.f32.mrb[1].mxu0 }
 0x141   :  { %v239_v27 = vadd.f32 %v238_v26, %v119_v23  ;;  %v240_v28 = vpop.f32.mrb[2].mxu0 }
 0x142   :  { %v243_v29 = vmax.f32 %v237_v25, 0.0  ;;  %v241_v30 = vpop.f32.mrb[3].mxu0 }
 0x143   :  { %v244_v31 = vmax.f32 %v239_v27, 0.0 }
 0x144   :  { %v245_v33 = vpack.c.bf16 %v243_v29, %v243_v29 }
 0x145   :  { %v246_v32 = vpack.c.bf16 %v244_v31, %v244_v31 }
 0x147   :  { %483 = vmatprep.mubr.bf16.mxu1 %v246_v32 }
 0x148   :  { %484 = vmatmul.mubr.bf16.vlgmr.msra.gmra.mrb[0].mxu1 %v245_v33 }
 0x21b   :  { %v485_v41 = vpop.f32.mrb[0].mxu1 }
 0x21c   :  { %v486_v42 = vadd.f32 %v485_v41, %v284_v39  ;;  %v487_v43 = vpop.f32.mrb[1].mxu1 }
 0x21d   :  { %v488_v44 = vadd.f32 %v487_v43, %v288_v40  ;;  %v489_v45 = vpop.f32.mrb[2].mxu1 }
 0x21e   :  { %v492_v46 = vmax.f32 %v486_v42, 0.0  ;;  %v490_v47 = vpop.f32.mrb[3].mxu1 }
 0x21f   :  { %v493_v48 = vmax.f32 %v488_v44, 0.0 }
 0x220   :  { %v494_v50 = vpack.c.bf16 %v492_v46, %v492_v46 }
 0x221   :  { %v495_v49 = vpack.c.bf16 %v493_v48, %v493_v48 }
 0x223   :  { %732 = vmatprep.mubr.bf16.mxu0 %v495_v49 }
 0x224   :  { %733 = vmatmul.mubr.bf16.vlgmr.msra.gmra.mrb[4].mxu0 %v494_v50 }
 0x2f7   :  { %v734_v55 = vpop.f32.mrb[4].mxu0 }
 0x2f8   :  { %v735_v56 = vadd.f32 %v734_v55, %v533_v52  ;;  %v736_v57 = vpop.f32.mrb[5].mxu0 }
 0x2f9   :  { %v737_v59 = vadd.f32 %v736_v57, %v537_v53  ;;  %v738_v60 = vpop.f32.mrb[6].mxu0 }
 0x2fa   :  { %v741_v62 = vmax.f32 %v735_v56, 0.0  ;;  %v739_v63 = vpop.f32.mrb[7].mxu0 }
 0x2fb   :  { %v742_v0 = vmax.f32 %v737_v59, 0.0 }
 0x2fc   :  { %v755_v1 = vmul.f32 %v748_v58, %v741_v62 }
 0x2fd   :  { %v756_v2 = vmul.f32 %v752_v61, %v742_v0 }
 0x2ff   :  { %v757_v3 = vadd.f32 %v756_v2, %v755_v1 }
 0x301   :  { %758 = vadd.xlane.f32.xlu0 %v757_v3 }
 0x38e   :  { %v759_v5 = vpop.xlane.xlu0 %758 }
 0x38f   :  { %v767_v6 = vadd.f32 %v857_v4, %v759_v5 }
 0x391   :  { %769 = vst.msk [vmem:[%s1220_s9] sm:$0xff] %vm768_vm1, %v767_v6 }
 0x392   :  { %774 = vsyncpa [#allocation5], 1 }
 0x393   :  { %775 = vsyncpa [#allocation7], 1 }
 0x394   :  { %776 = vsyncpa [#allocation10], 1 }

</bundles_post_ra>
